<compile_context>
chip_gen: v6e
topology: v6e:2x2x1
jax: 0.10.0
libtpu: 0.0.40
codegen_flags: <defaults>
</compile_context>

<pallas_src>
import jax
import jax.numpy as jnp
import numpy as np
from jax.experimental import pallas as pl
from jax.experimental.pallas import tpu as pltpu


# ----------------------------------------------------------------------------
# Pallas kernel: fused Wg@g, Wx@x, +bias, relu, psi projection, sigmoid,
#                and the broadcast gating multiply -- all channel-major,
#                looped over the batch-tile axis.
# ----------------------------------------------------------------------------
def _attention_gate_kernel(g_ref, x_ref,
                           wg_ref, wx_ref, b_ref,
                           wpsi_ref, bpsi_ref,
                           out_ref):
    wg = wg_ref[...]           # (F_int, F_l)
    wx = wx_ref[...]           # (F_int, F_g)
    bias = b_ref[...]          # (F_int, 1)   folded bg + bx
    wpsi = wpsi_ref[...]       # (F_int, 1)
    bpsi = bpsi_ref[0]         # scalar (SMEM)

    def gate_one(b):
        g = g_ref[b]                                               # (F_l, TP)
        x = x_ref[b]                                               # (F_g, TP)
        # 1x1 convs as channel-contraction matmuls, pixels in the lane axis.
        h = jnp.dot(wg, g, preferred_element_type=jnp.float32)     # (F_int, TP)
        h = h + jnp.dot(wx, x, preferred_element_type=jnp.float32)
        h = jnp.maximum(h + bias, 0.0)
        # psi projection: broadcast FMA + sublane reduce (XLU), sigmoid (EUP).
        logit = jnp.sum(h * wpsi, axis=0, keepdims=True) + bpsi    # (1, TP)
        psi = jax.nn.sigmoid(logit)
        out_ref[b] = (x * psi).astype(out_ref.dtype)               # gate x

    bt = g_ref.shape[0]
    if bt <= 8:
        for b in range(bt):          # short static trip-count: unroll
            gate_one(b)
    else:
        def body(b, carry):
            gate_one(b)
            return carry
        jax.lax.fori_loop(0, bt, body, 0)


# ----------------------------------------------------------------------------
# Tile planning: big streaming tiles, batch-blocking for small planes,
# never degrade to a 128-pixel tile, >=2 grid steps when cheaply possible.
# ----------------------------------------------------------------------------
def _largest_divisor_leq(n, cap):
    cap = max(1, min(n, int(cap)))
    for d in range(cap, 0, -1):
        if n % d == 0:
            return d
    return 1


def _largest_128_divisor_leq(npix, cap):
    t = (int(cap) // 128) * 128
    while t >= 128:
        if npix % t == 0:
            return t
        t -= 128
    return 0


def _plan_tiles(N, npix, dma_bytes_per_pixel, *, max_tile_pixels=32768,
                target_step_bytes=4 * 1024 * 1024):
    """Pick (batch_tile, pixel_tile, padded_npix)."""
    budget = max(128, int(target_step_bytes // max(dma_bytes_per_pixel, 1)))
    budget = min(budget, max_tile_pixels)
    budget = max(128, (budget // 128) * 128)

    batch_tile, pixel_tile, npix_pad = 1, npix, npix

    if npix % 128 == 0:
        if npix <= budget:
            pixel_tile = npix
            want_bt = max(1, budget // npix)        # block over batch too
            batch_tile = _largest_divisor_leq(N, want_bt)
        else:
            div = _largest_128_divisor_leq(npix, budget)
            if div >= max(512, budget // 4):
                pixel_tile = div                    # clean big divisor
            else:
                # Awkward factorization: near-uniform split, minimal pad.
                k = pl.cdiv(npix, budget)
                pixel_tile = (((npix + k - 1) // k) + 127) // 128 * 128
                npix_pad = k * pixel_tile
    else:
        # Pixel count not lane aligned (rare).  Full-plane block is legal
        # (block dim == array dim) and avoids any padding / output re-copy.
        if npix * dma_bytes_per_pixel <= 8 * target_step_bytes:
            pixel_tile = npix
            want_bt = max(1, budget // max(npix, 1))
            batch_tile = _largest_divisor_leq(N, want_bt)
        else:
            # TODO(synk): masked tail stores would remove the output re-copy
            # on this (very rare) padded path.
            pixel_tile = budget
            npix_pad = pl.cdiv(npix, pixel_tile) * pixel_tile

    # Ensure >=2 grid steps when cheaply possible so both v7x TensorCores
    # get work (harmless on v5e/v6e).
    steps = (N // batch_tile) * (npix_pad // pixel_tile)
    if steps == 1:
        if batch_tile % 2 == 0:
            batch_tile //= 2
        elif pixel_tile % 256 == 0:
            pixel_tile //= 2
    return batch_tile, pixel_tile, npix_pad


# ----------------------------------------------------------------------------
# Wrapper
# ----------------------------------------------------------------------------
def attention_block_pallas(g_nchw, x_nchw, params, *, max_tile_pixels=32768,
                           target_step_bytes=4 * 1024 * 1024):
    """g_nchw: (N, F_l, H, W), x_nchw: (N, F_g, H, W)  ->  (N, F_g, H, W)."""
    N, F_l, H, W = g_nchw.shape
    _, F_g, _, _ = x_nchw.shape
    F_int = params["wg"].shape[0]          # wg: (F_int, F_l)

    npix = H * W
    itemsize = jnp.dtype(x_nchw.dtype).itemsize
    dma_bpp = (F_l + 2 * F_g) * itemsize   # bytes/pixel streamed (g + x + out)

    bt, tile, npix_pad = _plan_tiles(
        N, npix, dma_bpp,
        max_tile_pixels=max_tile_pixels, target_step_bytes=target_step_bytes)

    g3 = g_nchw.reshape(N, F_l, npix)      # pure reshape, no transpose
    x3 = x_nchw.reshape(N, F_g, npix)
    if npix_pad != npix:
        pad = npix_pad - npix
        g3 = jnp.pad(g3, ((0, 0), (0, 0), (0, pad)))
        x3 = jnp.pad(x3, ((0, 0), (0, 0), (0, pad)))

    grid = (N // bt, npix_pad // tile)

    pix_spec = lambda C: pl.BlockSpec((bt, C, tile), lambda b, p: (b, 0, p))
    w_spec = lambda shp: pl.BlockSpec(shp, lambda b, p: (0, 0))

    b_sum = params["bg"] + params["bx"]    # (F_int, 1) folded bias

    # VMEM budget: double-buffered streaming blocks + f32 intermediates,
    # with slack; raises the 16 MiB v5e default, stays << 64 MiB (v7x).
    step_bytes = bt * tile * dma_bpp
    interm_bytes = bt * tile * (F_int + 2) * 4
    vmem_limit = int(min(48 * 2**20, max(32 * 2**20, 3 * step_bytes + interm_bytes)))

    out3 = pl.pallas_call(
        _attention_gate_kernel,
        out_shape=jax.ShapeDtypeStruct((N, F_g, npix_pad), x_nchw.dtype),
        grid_spec=pltpu.PrefetchScalarGridSpec(
            num_scalar_prefetch=0,
            grid=grid,
            in_specs=[
                pix_spec(F_l),                               # g tile   (bt, F_l, TP)
                pix_spec(F_g),                               # x tile   (bt, F_g, TP)
                w_spec((F_int, F_l)),                        # Wg (BN folded)
                w_spec((F_int, F_g)),                        # Wx (BN folded)
                w_spec((F_int, 1)),                          # bg + bx
                w_spec((F_int, 1)),                          # Wpsi column
                pl.BlockSpec(memory_space=pltpu.MemorySpace.SMEM),  # bpsi scalar
            ],
            out_specs=pix_spec(F_g),
        ),
        compiler_params=pltpu.CompilerParams(
            dimension_semantics=("parallel", "parallel"),
            vmem_limit_bytes=vmem_limit),
    )(g3, x3,
      params["wg"], params["wx"], b_sum,
      params["wpsi"], params["bpsi"])

    if npix_pad != npix:
        # TODO(synk): rare path; masked in-kernel tail stores would avoid this copy.
        out3 = out3[:, :, :npix]
    return out3.reshape(N, F_g, H, W)


# ----------------------------------------------------------------------------
# Deterministic parameter construction (Conv1x1 + BN folded into scale/bias).
# ----------------------------------------------------------------------------
def _fold_conv_bn(key, c_in, c_out, eps=1e-5):
    k1, k2, k3, k4, k5, k6 = jax.random.split(key, 6)
    w = jax.random.normal(k1, (c_out, c_in), jnp.float32) * 0.3   # conv weight (1x1)
    b = jax.random.normal(k2, (c_out,), jnp.float32) * 0.1        # conv bias
    gamma = 1.0 + 0.1 * jax.random.normal(k3, (c_out,), jnp.float32)
    beta = 0.1 * jax.random.normal(k4, (c_out,), jnp.float32)
    mean = 0.1 * jax.random.normal(k5, (c_out,), jnp.float32)
    var = jnp.abs(jax.random.normal(k6, (c_out,), jnp.float32)) + 0.5
    scale = gamma / jnp.sqrt(var + eps)
    w_fold = (w * scale[:, None]).astype(jnp.float32)             # (c_out, c_in)
    b_fold = ((b - mean) * scale + beta).astype(jnp.float32)      # (c_out,)
    return w_fold, b_fold


def make_params(F_g, F_l, F_int, key):
    kg, kx, kp = jax.random.split(key, 3)
    wg, bg = _fold_conv_bn(kg, F_l, F_int)       # W_g acts on g (F_l channels)
    wx, bx = _fold_conv_bn(kx, F_g, F_int)       # W_x acts on x (F_g channels)
    wpsi, bpsi = _fold_conv_bn(kp, F_int, 1)     # psi conv -> 1 channel
    return dict(
        wg=wg,                          # (F_int, F_l)
        bg=bg.reshape(F_int, 1),        # (F_int, 1)
        wx=wx,                          # (F_int, F_g)
        bx=bx.reshape(F_int, 1),        # (F_int, 1)
        wpsi=wpsi.T.reshape(F_int, 1),  # (F_int, 1) column for broadcast FMA
        bpsi=bpsi.reshape(1),           # (1,) scalar (SMEM)
    )


# ----------------------------------------------------------------------------
# Pure-JAX reference (same folded-BN semantics) for a correctness check.
# ----------------------------------------------------------------------------
def attention_block_ref(g_nchw, x_nchw, p):
    N, F_l, H, W = g_nchw.shape
    F_g = x_nchw.shape[1]
    g3 = g_nchw.astype(jnp.float32).reshape(N, F_l, -1)
    x3 = x_nchw.astype(jnp.float32).reshape(N, F_g, -1)
    g1 = jnp.einsum("oc,ncp->nop", p["wg"], g3) + p["bg"][None]
    x1 = jnp.einsum("oc,ncp->nop", p["wx"], x3) + p["bx"][None]
    h = jnp.maximum(g1 + x1, 0.0)
    logit = jnp.einsum("c,ncp->np", p["wpsi"][:, 0], h)[:, None, :] + p["bpsi"][0]
    psi = jax.nn.sigmoid(logit)
    out = x3 * psi
    return out.reshape(N, F_g, H, W)


if __name__ == "__main__":
    key = jax.random.PRNGKey(0)

    # Case 1: small shapes consistent with the module (g has F_l, x has F_g).
    N, H, W = 2, 16, 16
    F_g, F_l, F_int = 4, 6, 8
    kg, kx, kp, key = jax.random.split(key, 4)
    g = jax.random.normal(kg, (N, F_l, H, W), jnp.float32)
    x = jax.random.normal(kx, (N, F_g, H, W), jnp.float32)
    params = make_params(F_g, F_l, F_int, kp)

    out = jax.block_until_ready(attention_block_pallas(g, x, params))
    ref = attention_block_ref(g, x, params)
    np.testing.assert_allclose(np.asarray(out), np.asarray(ref), rtol=1e-5, atol=1e-5)

    # Case 2: exercises batch-blocking (batch_tile > 1) on a slightly larger plane.
    N2, H2, W2 = 4, 32, 32
    kg2, kx2, key = jax.random.split(key, 3)
    g2 = jax.random.normal(kg2, (N2, F_l, H2, W2), jnp.float32)
    x2 = jax.random.normal(kx2, (N2, F_g, H2, W2), jnp.float32)
    out2 = jax.block_until_ready(attention_block_pallas(g2, x2, params))
    ref2 = attention_block_ref(g2, x2, params)
    np.testing.assert_allclose(np.asarray(out2), np.asarray(ref2), rtol=1e-5, atol=1e-5)

    # Case 3: bf16 I/O path (halves HBM traffic on v6e/v7x); loose tolerance.
    g_bf = g.astype(jnp.bfloat16)
    x_bf = x.astype(jnp.bfloat16)
    out_bf = jax.block_until_ready(attention_block_pallas(g_bf, x_bf, params))
    assert out_bf.dtype == jnp.bfloat16
    np.testing.assert_allclose(np.asarray(out_bf, dtype=np.float32), np.asarray(ref),
                               rtol=1e-1, atol=1e-1)

    print("KERNEL_OK")
</pallas_src>

<mosaic_0001>
module attributes {stable_mosaic.version = 11 : i64} {
  func.func @_attention_gate_kernel(%arg0: i32, %arg1: i32, %arg2: memref<1x6x256xf32, #tpu.memory_space<vmem>>, %arg3: memref<1x4x256xf32, #tpu.memory_space<vmem>>, %arg4: memref<8x6xf32, #tpu.memory_space<vmem>>, %arg5: memref<8x4xf32, #tpu.memory_space<vmem>>, %arg6: memref<8x1xf32, #tpu.memory_space<vmem>>, %arg7: memref<8x1xf32, #tpu.memory_space<vmem>>, %arg8: memref<1xf32, #tpu.memory_space<smem>>, %arg9: memref<1x4x256xf32, #tpu.memory_space<vmem>>) attributes {dimension_semantics = [#tpu.dimension_semantics<parallel>, #tpu.dimension_semantics<parallel>], iteration_bounds = array<i64: 2, 1>, scalar_prefetch = 0 : i64, scratch_operands = 0 : i64, tpu.core_type = #tpu.core_type<tc>, window_params = [{transform_indices = @transform_0, window_bounds = array<i64: 1, 6, 256>}, {transform_indices = @transform_1, window_bounds = array<i64: 1, 4, 256>}, {pipeline_mode = #tpu.pipeline_mode<synchronous>, transform_indices = @transform_2, window_bounds = array<i64: 8, 6>}, {pipeline_mode = #tpu.pipeline_mode<synchronous>, transform_indices = @transform_3, window_bounds = array<i64: 8, 4>}, {pipeline_mode = #tpu.pipeline_mode<synchronous>, transform_indices = @transform_4, window_bounds = array<i64: 8, 1>}, {pipeline_mode = #tpu.pipeline_mode<synchronous>, transform_indices = @transform_5, window_bounds = array<i64: 8, 1>}, {transform_indices = @transform_6, window_bounds = array<i64: 1>}, {transform_indices = @transform_7, window_bounds = array<i64: 1, 4, 256>}]} {
    %c0 = arith.constant 0 : index
    %c0_0 = arith.constant 0 : index
    %0 = vector.load %arg4[%c0, %c0_0] : memref<8x6xf32, #tpu.memory_space<vmem>>, vector<8x6xf32>
    %c0_1 = arith.constant 0 : index
    %c0_2 = arith.constant 0 : index
    %1 = vector.load %arg5[%c0_1, %c0_2] : memref<8x4xf32, #tpu.memory_space<vmem>>, vector<8x4xf32>
    %c0_3 = arith.constant 0 : index
    %c0_4 = arith.constant 0 : index
    %2 = vector.load %arg6[%c0_3, %c0_4] : memref<8x1xf32, #tpu.memory_space<vmem>>, vector<8x1xf32>
    %c0_5 = arith.constant 0 : index
    %c0_6 = arith.constant 0 : index
    %3 = vector.load %arg7[%c0_5, %c0_6] : memref<8x1xf32, #tpu.memory_space<vmem>>, vector<8x1xf32>
    %c0_7 = arith.constant 0 : index
    %4 = memref.load %arg8[%c0_7] : memref<1xf32, #tpu.memory_space<smem>>
    %c0_8 = arith.constant 0 : index
    %c0_9 = arith.constant 0 : index
    %c0_10 = arith.constant 0 : index
    %5 = vector.load %arg2[%c0_8, %c0_9, %c0_10] : memref<1x6x256xf32, #tpu.memory_space<vmem>>, vector<1x6x256xf32>
    %6 = vector.shape_cast %5 : vector<1x6x256xf32> to vector<6x256xf32>
    %c0_11 = arith.constant 0 : index
    %c0_12 = arith.constant 0 : index
    %c0_13 = arith.constant 0 : index
    %7 = vector.load %arg3[%c0_11, %c0_12, %c0_13] : memref<1x4x256xf32, #tpu.memory_space<vmem>>, vector<1x4x256xf32>
    %8 = vector.shape_cast %7 : vector<1x4x256xf32> to vector<4x256xf32>
    %cst = arith.constant dense<0.000000e+00> : vector<8x256xf32>
    %9 = tpu.matmul %0, %6, %cst {dimension_numbers = #tpu.dot_dimension_numbers<[1], [0], [0], [1], [0, 0, 1, 1], [], []>} : vector<8x6xf32>, vector<6x256xf32>, vector<8x256xf32> -> vector<8x256xf32>
    %cst_14 = arith.constant dense<0.000000e+00> : vector<8x256xf32>
    %10 = tpu.matmul %1, %8, %cst_14 {dimension_numbers = #tpu.dot_dimension_numbers<[1], [0], [0], [1], [0, 0, 1, 1], [], []>} : vector<8x4xf32>, vector<4x256xf32>, vector<8x256xf32> -> vector<8x256xf32>
    %11 = arith.addf %9, %10 : vector<8x256xf32>
    %12 = vector.broadcast %2 : vector<8x1xf32> to vector<8x256xf32>
    %13 = arith.addf %11, %12 : vector<8x256xf32>
    %cst_15 = arith.constant 0.000000e+00 : f32
    %14 = vector.broadcast %cst_15 : f32 to vector<8x256xf32>
    %15 = arith.maximumf %13, %14 : vector<8x256xf32>
    %16 = vector.broadcast %3 : vector<8x1xf32> to vector<8x256xf32>
    %17 = arith.mulf %15, %16 : vector<8x256xf32>
    %cst_16 = arith.constant dense<0.000000e+00> : vector<256xf32>
    %18 = vector.multi_reduction <add>, %17, %cst_16 [0] : vector<8x256xf32> to vector<256xf32>
    %19 = vector.shape_cast %18 : vector<256xf32> to vector<1x256xf32>
    %20 = vector.broadcast %4 : f32 to vector<1x256xf32>
    %21 = arith.addf %19, %20 : vector<1x256xf32>
    %22 = arith.negf %21 : vector<1x256xf32>
    %23 = math.exp %22 : vector<1x256xf32>
    %cst_17 = arith.constant 1.000000e+00 : f32
    %24 = vector.broadcast %cst_17 : f32 to vector<1x256xf32>
    %25 = arith.addf %24, %23 : vector<1x256xf32>
    %26 = arith.divf %24, %25 : vector<1x256xf32>
    %27 = vector.broadcast %26 : vector<1x256xf32> to vector<4x256xf32>
    %28 = arith.mulf %8, %27 : vector<4x256xf32>
    %c0_18 = arith.constant 0 : index
    %c0_19 = arith.constant 0 : index
    %c0_20 = arith.constant 0 : index
    %29 = vector.load %arg9[%c0_18, %c0_19, %c0_20] : memref<1x4x256xf32, #tpu.memory_space<vmem>>, vector<1x4x256xf32>
    %30 = vector.shape_cast %29 : vector<1x4x256xf32> to vector<4x256xf32>
    %31 = vector.shape_cast %28 : vector<4x256xf32> to vector<1x4x256xf32>
    tpu.vector_store %arg9[%c0_18, %c0_19, %c0_20], %31 {strides = array<i32>} : memref<1x4x256xf32, #tpu.memory_space<vmem>>, vector<1x4x256xf32>,
    return
  }
  func.func @transform_0(%arg0: i32, %arg1: i32) -> (i32, i32, i32) {
    %c0_i32 = arith.constant 0 : i32
    %c0_i32_0 = arith.constant 0 : i32
    return %arg0, %c0_i32, %arg1 : i32, i32, i32
  }
  func.func @transform_1(%arg0: i32, %arg1: i32) -> (i32, i32, i32) {
    %c0_i32 = arith.constant 0 : i32
    %c0_i32_0 = arith.constant 0 : i32
    return %arg0, %c0_i32, %arg1 : i32, i32, i32
  }
  func.func @transform_2(%arg0: i32, %arg1: i32) -> (i32, i32) {
    %c0_i32 = arith.constant 0 : i32
    %c0_i32_0 = arith.constant 0 : i32
    %c0_i32_1 = arith.constant 0 : i32
    return %c0_i32, %c0_i32_0 : i32, i32
  }
  func.func @transform_3(%arg0: i32, %arg1: i32) -> (i32, i32) {
    %c0_i32 = arith.constant 0 : i32
    %c0_i32_0 = arith.constant 0 : i32
    %c0_i32_1 = arith.constant 0 : i32
    return %c0_i32, %c0_i32_0 : i32, i32
  }
  func.func @transform_4(%arg0: i32, %arg1: i32) -> (i32, i32) {
    %c0_i32 = arith.constant 0 : i32
    %c0_i32_0 = arith.constant 0 : i32
    %c0_i32_1 = arith.constant 0 : i32
    return %c0_i32, %c0_i32_0 : i32, i32
  }
  func.func @transform_5(%arg0: i32, %arg1: i32) -> (i32, i32) {
    %c0_i32 = arith.constant 0 : i32
    %c0_i32_0 = arith.constant 0 : i32
    %c0_i32_1 = arith.constant 0 : i32
    return %c0_i32, %c0_i32_0 : i32, i32
  }
  func.func @transform_6(%arg0: i32, %arg1: i32) -> i32 {
    %c0_i32 = arith.constant 0 : i32
    %c0_i32_0 = arith.constant 0 : i32
    return %c0_i32 : i32
  }
  func.func @transform_7(%arg0: i32, %arg1: i32) -> (i32, i32, i32) {
    %c0_i32 = arith.constant 0 : i32
    %c0_i32_0 = arith.constant 0 : i32
    return %arg0, %c0_i32, %arg1 : i32, i32, i32
  }
}

</mosaic_0001>

<bundles_post_ra>
// kernel: tpu_custom_call.1
= control target key start
LH: loop header
LB: loop body
LE: loop exit
PB: predicated region body
PF: predicated region fallthrough
CT: control target
= control target key end

     0   :  { %s1008_s0 = inlined_call_operand.vmem [shape: f32[2,6,256], index: 0, kind: input, shape index: {}]   ;;  %s1009_s1 = inlined_call_operand.vmem [shape: f32[2,4,256], index: 1, kind: input, shape index: {}]   ;;  %s1010_s2 = inlined_call_operand.vmem [shape: f32[8,6], index: 2, kind: input, shape index: {}]   ;;  %s1011_s3 = inlined_call_operand.vmem [shape: f32[8,4], index: 3, kind: input, shape index: {}]   ;;  %s1012_s4 = inlined_call_operand.vmem [shape: f32[8,1], index: 4, kind: input, shape index: {}]   ;;  %s1013_s5 = inlined_call_operand.vmem [shape: f32[8,1], index: 5, kind: input, shape index: {}]   ;;  %s1014_s6 = inlined_call_operand.<no memory space> [shape: f32[1], index: 6, kind: input, shape index: {}]   ;;  %s1015_s7 = inlined_call_operand.hbm [shape: f32[2,4,256], index: 7, kind: output, shape index: {}]  }
   0x1   :  { %12 = sst [smem:[#allocation2]] %s1014_s6 }
   0x2   :  { %13 = vsyncpa [#allocation4], 0 }
   0x3   :  { %15 = vsyncpa [#allocation4 + $0x1], 0  ;;  %s894_s26 = smov 0   ;;  %s896_s27 = smov 0  }
   0x4   :  { %s898_s28 = smov 0   ;;  %s900_s29 = smov 0  }
   0x5   :  { %s902_s30 = smov 0   ;;  %s904_s8 = smov 0  }
   0x6 LB: > { %s677_s6 = sadd.s32 4294967295, %s846_s8   ;;  %s678_s9 = sadd.s32 4294967294, %s846_s8   ;;  %s846_s8 = sphi %s904_s8, %s21_s8   ;;  %s842_s30 = sphi %s902_s30, %s1022_s30   ;;  %s838_s29 = sphi %s900_s29, %s1021_s29   ;;  %s834_s28 = sphi %s898_s28, %s1020_s28   ;;  %s830_s27 = sphi %s896_s27, %s1019_s27   ;;  %s826_s26 = sphi %s894_s26, %s1018_s26  }
   0x7   : > { %s33_s10 = sadd.s32 1, %s842_s30  ;;  %s203_s11 = sadd.s32 1, %s834_s28 }
   0x8   : > { %p35_p0 = scmp.ge.s32.totalorder %s33_s10, 2  ;;  %p213_p1 = scmp.ne.s32.totalorder %s834_s28, %s830_s27 }
   0x9   : > { %p214_p2 = scmp.eq.s32.totalorder %s677_s6, 1  ;;  %p219_p3 = scmp.ne.s32.totalorder %s830_s27, %s826_s26 }
   0xa   : > { %s1024_s10 = smov (%p35_p0, %s33_s10), 0  ;;  %p220_p5 = scmp.eq.s32.totalorder %s678_s9, 1 }
   0xb   : > { %p934_p4 = por %p214_p2, %p213_p1  ;;  %s198_s13 = ssub.s32 %s842_s30, %s1024_s10 }
   0xc   : > { %p681_p6 = scmp.ge.s32.totalorder %s846_s8, 1  ;;  %p201_p7 = scmp.eq.s32.totalorder %s198_s13, 0 }
   0xd   : > { %p941_p8 = por %p220_p5, %p219_p3  ;;  %p279_p9 = scmp.lt.s32.totalorder %s846_s8, 3 }
   0xe   : > { %s947_s15 = scalar_select %p201_p7, %s834_s28, %s203_s11  }
   0xf   : > { %p280_p10 = pnand %p681_p6, %p279_p9 }
  0x10   : > { %p325_p11 = scmp.lt.s32.totalorder (!%p280_p10), %s838_s29, 1  ;;  %s702_s22 = sshll.u32 (!%p280_p10), %s838_s29, 7 }
  0x11   : > { %283 = sbr.rel (%p280_p10) target bundleno = 298 (0x12a), region = 48  ;;  %s581_s9 = scalar_lea.hbm (!%p280_p10), %s1015_s7, %s702_s22 }
  0x12   : > { %s850_s16 = smov (!%p280_p10), [#allocation3]  }
  0x13   : > { %s774_s17 = sshll.u32 (!%p280_p10), %s850_s16, 4  ;;  %s775_s17 = int_to_ptr.vmem [resolvable:$false] %s774_s17 }
  0x16   : > { %v848_v0 = vmov 0.0   ;;  %v347_v1 = vld [vmem:[%s1012_s4] sm:$0xff]  ;;  %s326_s18 = scalar_select %p325_p11, %s838_s29, 1  ;;  %v849_v2 = vmov 0   ;;  %vm439_vm0 = vcmask 1045504   ;;  %vm359_vm1 = vcmask 1043456  }
  0x17   : > { %510 = vmatprep.mubr.f32.mxu1 %v848_v0  ;;  %428 = vmatprep.mubr.f32.mxu0 %v848_v0  ;;  %v348_v3 = vld [vmem:[%s1013_s5] sm:$0xff]  ;;  %vm435_vm2 = vcmask 48128   ;;  %vm355_vm3 = vcmask 31744   ;;  %s776_s29 = scalar_lea.vmem %s775_s17, 256 }
  0x18   : > { %760 = vset.pattern.permute.xlu0 %v849_v2  ;;  %s700_s19 = sshll.u32 %s326_s18, 4  ;;  %s701_s20 = sshll.u32 %s326_s18, 3  ;;  %v345_v4 = vld [vmem:[%s1010_s2] sm:$0xff] }
  0x19   : > { %519 = vperm.xlu0 %760, %v347_v1   ;;  %s332_s25 = scalar_lea.vmem %s1008_s0, %s700_s19  ;;  %s342_s11 = scalar_lea.vmem %s1009_s1, %s701_s20  ;;  %v346_v9 = vld [vmem:[%s1011_s3] sm:$0xff] }
  0x1a   : > { %v351_v5 = vld [vmem:[%s332_s25 + $0x8] sm:$0x3f]  ;;  %v350_v6 = vld [vmem:[%s332_s25] sm:$0x3f]  ;;  %s349_s19 = sld [smem:[#allocation2]]  ;;  %s321_s20 = sand.u32 1, %s830_s27  }
  0x1b   : > { %v352_v7 = vld [vmem:[%s342_s11] sm:$0xff]  ;;  %690 = vmatprep.subr.msk.mxu1 %vm439_vm0, %v351_v5  ;;  %s682_s21 = sshll.u32 %s321_s20, 3  ;;  %s567_s11 = scalar_lea.sflag [#allocation4], %s321_s20 }
  0x1c   : > { %v354_v8 = vcombine.high %v352_v7, %v352_v7  ;;  %691 = vmatpush1.msk.msra.mxu1 %vm439_vm0, %v350_v6  ;;  %s323_s23 = scalar_lea.vmem [#allocation3], %s682_s21 }
  0x1d   : > { %528 = vperm.xlu0 %760, %v348_v3   ;;  %692 = vmatmul.mubr.msk.f32.vlgmr.msra.gmra.mxu1 %vm435_vm2, %v345_v4  ;;  %s583_s24 = sshll.u32 %s323_s23, 4  ;;  %s584_s24 = int_to_ptr.vmem [resolvable:$true] %s583_s24 }
  0x1e   : > { %687 = vmatprep.subr.msk.mxu0 %vm359_vm1, %v354_v8  ;;  %s770_s13 = scalar_lea.vmem %s584_s24, 128  ;;  %p777_p1 = scmp.lt.s32.totalorder %s584_s24, %s775_s17 }
  0x1f   : > { %688 = vmatpush1.msk.msra.mxu0 %vm359_vm1, %v352_v7  ;;  %p771_p12 = scmp.ne.s32.totalorder %s584_s24, %s770_s13  ;;  %p778_p2 = scmp.lt.s32.totalorder %s776_s29, %s770_s13 }
  0x20   : > { %689 = vmatmul.mubr.msk.f32.vlgmr.msra.gmra.mxu0 %vm355_vm3, %v346_v9  ;;  %v545_v33 = vstv %s349_s19 }
  0x21   : > { %p772_p13 = pnand %p771_p12, %p934_p4  ;;  %p779_p3 = por %p778_p2, %p777_p1 }
  0x23   : > { %p773_p0 = pneg %p772_p13 }
  0x25   : > { %p780_p5 = pnand %p779_p3, %p773_p0 }
  0x94   : > { %v520_v11 = vpop.permute.xlu0 %519 }
  0x98   : > { %v529_v20 = vpop.permute.xlu0 %528 }
  0xdd   : > { %v512_v10 = vpop.f32.mrf.mxu1 }
  0xdf   : > { %v514_v14 = vpop.f32.mrf.mxu1 }
  0xe0   : > { %v430_v12 = vpop.f32.mrf.mxu0 }
  0xe1   : > { %v513_v13 = vadd.f32 %v512_v10, %v430_v12 }
  0xe2   : > { %v432_v15 = vpop.f32.mrf.mxu0 }
  0xe3   : > { %v522_v16 = vadd.f32 %v520_v11, %v513_v13  ;;  %v515_v17 = vadd.f32 %v514_v14, %v432_v15 }
  0xe5   : > { %v523_v18 = vadd.f32 %v520_v11, %v515_v17  ;;  %v524_v19 = vmax.f32 %v522_v16, 0.0 }
  0xe7   : > { %v525_v21 = vmax.f32 %v523_v18, 0.0  ;;  %v531_v22 = vmul.f32 %v529_v20, %v524_v19 }
  0xe9   : > { %v532_v23 = vmul.f32 %v529_v20, %v525_v21  ;;  %v533_v24 = vrot.slane %v531_v22, 4 }
  0xeb   : > { %v534_v25 = vadd.f32 %v533_v24, %v531_v22  ;;  %v539_v26 = vrot.slane %v532_v23, 4 }
  0xed   : > { %v535_v27 = vrot.slane %v534_v25, 2  ;;  %v540_v28 = vadd.f32 %v539_v26, %v532_v23 }
  0xef   : > { %v536_v29 = vadd.f32 %v535_v27, %v534_v25  ;;  %v541_v30 = vrot.slane %v540_v28, 2 }
  0xf1   : > { %v537_v31 = vrot.slane %v536_v29, 1  ;;  %v542_v32 = vadd.f32 %v541_v30, %v540_v28 }
  0xf3   : > { %v538_v34 = vadd.f32 %v537_v31, %v536_v29  ;;  %v543_v35 = vrot.slane %v542_v32, 1 }
  0xf5   : > { %v544_v36 = vadd.f32 %v543_v35, %v542_v32  ;;  %v546_v37 = vadd.f32 %v545_v33, %v538_v34 }
  0xf7   : > { %v547_v38 = vadd.f32 %v545_v33, %v544_v36  ;;  %v693_v39 = vmul.f32 -1.442695, %v546_v37 }
  0xf9   : > { %762 = vpow2.f32 %v693_v39  ;;  %v694_v40 = vmul.f32 -1.442695, %v547_v38 }
  0xfb   : > { %764 = vpow2.f32 %v694_v40 }
 0x106   : > { %v763_v41 = vpop.eup %762 }
 0x107   : > { %v554_v42 = vadd.f32 1.0, %v763_v41 }
 0x108   : > { %v765_v43 = vpop.eup %764 }
 0x109   : > { %v555_v44 = vadd.f32 1.0, %v765_v43  ;;  %766 = vrcp.f32 %v554_v42 }
 0x10b   : > { %768 = vrcp.f32 %v555_v44 }
 0x116   : > { %v767_v45 = vpop.eup %766 }
 0x118   : > { %v769_v46 = vpop.eup %768 }
 0x119   : > { %v562_v47 = vcombine.low %v767_v45, %v769_v46 }
 0x11b   : > { %v564_v48 = vmul.f32 %v562_v47, %v352_v7 }
 0x11d   : > { %565 = vst [vmem:[%s323_s23] sm:$0xff] %v564_v48 }
 0x11e   : > { %783 = shalt.err (!%p780_p5)
}
 0x11f   : > { %s784_s18 = scalar_lea.hbm %s581_s9, 128  ;;  %s788_s21 = scalar_lea.hbm %s1015_s7, 256 }
 0x120   : > { %p785_p6 = scmp.ne.s32.totalorder %s581_s9, %s784_s18  ;;  %p789_p10 = scmp.lt.s32.totalorder %s581_s9, %s1015_s7 }
 0x121   : > { %p790_p11 = scmp.lt.s32.totalorder %s788_s21, %s784_s18 }
 0x122   : > { %p786_p7 = pnand %p785_p6, %p934_p4 }
 0x123   : > { %p791_p12 = por %p790_p11, %p789_p10 }
 0x124   : > { %p787_p9 = pneg %p786_p7 }
 0x126   : > { %p792_p13 = pnand %p791_p12, %p787_p9 }
 0x128   : > { %795 = shalt.err (!%p792_p13)
}
 0x129   : > { %703 = dma.vmem_to_hbm [thread:$0]  (%p934_p4), %s584_s24, 128, %s581_s9, %s567_s11  }
 0x12a PF: > { %p709_p0 = scmp.ge.s32.totalorder %s846_s8, 2  ;;  %s595_s25 = sand.u32 1, %s826_s26  }
 0x12b   : > { %s596_s6 = scalar_lea.sflag [#allocation4], %s595_s25 }
 0x12c   : > { %p706_p1 = pnand %p709_p0, %p941_p8 }
 0x12e   : > { %p707_p2 = pneg %p706_p1 }
 0x130   : > { %821 = dma.done.wait (%p707_p2), %s596_s6, 128  }
 0x131   : > { %823 = vsyncadd (%p707_p2), %s596_s6, 4294967168  ;;  %s21_s8 = sadd.s32 1, %s846_s8   ;;  %s1018_s26 = smov %s830_s27 }
 0x132   : > { %p18_p3 = scmp.ge.s32.totalorder %s21_s8, 4   ;;  %s1019_s27 = smov %s834_s28 }
 0x133   : > { %s1020_s28 = smov %s947_s15  ;;  %s1021_s29 = smov %s842_s30 }
 0x134   : > { %s1022_s30 = smov %s1024_s10  ;;  %20 = sbr.rel (!%p18_p3) target bundleno = 6 (0x6), region = 86 }
 0x139   :  { %601 = vsyncpa [#allocation4], 1 }
 0x13a   :  { %603 = vsyncpa [#allocation4 + $0x1], 1 }

</bundles_post_ra>
